<compile_context>
chip_gen: v5e
topology: v5e:2x2
jax: 0.10.0
libtpu: 0.0.40
codegen_flags: <defaults>
</compile_context>

<pallas_src>
import functools

import jax
import jax.numpy as jnp
from jax.experimental import pallas as pl
from jax.experimental.pallas import tpu as pltpu


def _round_up(n, m):
    return ((n + m - 1) // m) * m


# ----------------------------- Pallas kernel --------------------------------
def _lmlp_fused_kernel(x_ref, w1_ref, w2_ref, w3_ref, bias_ref, o_ref):
    """One row-tile of the fused multi-head MLP.

    x_ref   : (TM, flat)        raw flattened input tile (lifting folded into w1)
    w1_ref  : (flat, YH1p)      lift-folded, head-concatenated layer-1 weights
    w2_ref  : (YH1p, YH2p)      block-diagonal layer-2 weights (zero off-diag/pad)
    w3_ref  : (YH2p, Y)         block "diagonal" layer-3 weights
    bias_ref: (3, W)            row 0 = b1 (padded), row 1 = b2, row 2 = b3
    o_ref   : (TM, Y)           lane-dense output, heads on the lane axis
    """
    yh1p = w1_ref.shape[1]
    yh2p = w2_ref.shape[1]
    dim_y = w3_ref.shape[1]

    x = x_ref[...]
    h1 = jnp.dot(x, w1_ref[...], preferred_element_type=jnp.float32)
    h1 = jnp.maximum(h1 + bias_ref[0:1, :yh1p], 0.0)
    h2 = jnp.dot(h1, w2_ref[...], preferred_element_type=jnp.float32)
    h2 = jnp.maximum(h2 + bias_ref[1:2, :yh2p], 0.0)
    y = jnp.dot(h2, w3_ref[...], preferred_element_type=jnp.float32)
    o_ref[...] = y + bias_ref[2:3, :dim_y]


# --------------------------- lifting index helper -----------------------------
def lift_flat_indices(n1, n2, n3, x1_rate, x2_rate, x3_rate, y_rate, n_feat):
    """Flattened (t*n_feat + f) index of each lifted column, in torch.cat order."""
    idx = []
    for t in range(x1_rate - 1, y_rate, x1_rate):
        idx += [t * n_feat + f for f in range(n1)]
    for t in range(x2_rate - 1, y_rate, x2_rate):
        idx += [t * n_feat + f for f in range(n1, n1 + n2)]
    for t in range(x3_rate - 1, y_rate, x3_rate):
        idx += [t * n_feat + f for f in range(n_feat - n3, n_feat)]
    return idx


# ----------------------------- weight packing (once) --------------------------
def pack_lmlp_params(params, lift_idx, flat_dim, lane_pad=128):
    """Stacked per-head params -> fused / block-diagonal matrices.

    Runs ONCE at init (hoisted out of the forward path).  Off-diagonal / padded
    entries are explicit zeros, and the multi-rate lifting is folded into the
    layer-1 weight as an exact row scatter, so the fusion is not approximate.
    """
    w1, b1 = params["w1"], params["b1"]  # (Y, Dx, H1), (Y, 1, H1)
    w2, b2 = params["w2"], params["b2"]  # (Y, H1, H2), (Y, 1, H2)
    w3, b3 = params["w3"], params["b3"]  # (Y, H2, 1),  (Y, 1, 1)

    Y, Dx, H1 = w1.shape
    H2 = w2.shape[2]
    yh1, yh2 = Y * H1, Y * H2
    yh1p = _round_up(yh1, lane_pad)
    yh2p = _round_up(yh2, lane_pad)
    eye = jnp.eye(Y, dtype=w1.dtype)

    # Layer 1: concatenate heads along lanes, then fold the lifting in by
    # scattering rows to their flattened-x positions (unused rows stay zero).
    w1_cat = jnp.transpose(w1, (1, 0, 2)).reshape(Dx, yh1)          # (Dx, Y*H1)
    w1_lift = jnp.zeros((flat_dim, yh1p), w1.dtype)
    w1_lift = w1_lift.at[jnp.asarray(lift_idx), :yh1].add(w1_cat)   # (flat, YH1p)

    # Layer 2: block-diagonal, zero-padded to lane multiples.
    w2_bd = jnp.einsum("yab,yz->yazb", w2, eye).reshape(yh1, yh2)
    w2_bd = jnp.zeros((yh1p, yh2p), w2.dtype).at[:yh1, :yh2].set(w2_bd)

    # Layer 3: head y's (H2,) vector lives in rows y*H2:(y+1)*H2 of column y.
    w3_bd = jnp.einsum("yh,yz->yhz", w3[:, :, 0], eye).reshape(yh2, Y)
    w3_bd = jnp.zeros((yh2p, Y), w3.dtype).at[:yh2, :].set(w3_bd)

    # Bias slab: one DMA instead of three.  Padded entries are zero so the
    # padded hidden columns stay exactly zero after ReLU.
    bw = max(yh1p, yh2p)
    bias = jnp.zeros((3, bw), w1.dtype)
    bias = bias.at[0, :yh1].set(b1.reshape(yh1))
    bias = bias.at[1, :yh2].set(b2.reshape(yh2))
    bias = bias.at[2, :Y].set(b3.reshape(Y))

    return {"w1": w1_lift, "w2": w2_bd, "w3": w3_bd, "bias": bias}


# ------------------------------ pallas wrapper --------------------------------
def lmlp_pallas(x, packed, row_tile=128):
    """Fused multi-head MLP forward.

    x:      (B, y_rate, n_feat) float32 raw input (lifting is folded into w1)
    packed: output of pack_lmlp_params (computed once at init)
    returns (B, dim_y) float32  (== torch.stack(y, dim=1))
    """
    B = x.shape[0]
    flat = x.shape[1] * x.shape[2]
    x_flat = x.reshape(B, flat)                       # free reshape (contiguous)

    w1, w2, w3, bias = packed["w1"], packed["w2"], packed["w3"], packed["bias"]
    assert w1.shape[0] == flat
    yh1p, yh2p = w1.shape[1], w2.shape[1]
    dim_y = w3.shape[1]
    bw = bias.shape[1]

    tm = min(row_tile, B)
    if B % tm:
        x_flat = jnp.pad(x_flat, ((0, tm - B % tm), (0, 0)))
    bp = x_flat.shape[0]
    grid = (bp // tm,)

    flops = 2 * bp * (flat * yh1p + yh1p * yh2p + yh2p * dim_y)
    bytes_accessed = 4 * (x_flat.size + w1.size + w2.size + w3.size +
                          bias.size + bp * dim_y)

    # Resident VMEM: packed weights ~160 KB + 2x-buffered (tm, flat)/(tm, Y)
    # tiles — comfortably under v7x's 32 MiB scoped default, no override needed.
    out = pl.pallas_call(
        _lmlp_fused_kernel,
        out_shape=jax.ShapeDtypeStruct((bp, dim_y), jnp.float32),
        grid=grid,
        in_specs=[
            pl.BlockSpec((tm, flat), lambda i: (i, 0)),      # x tile (streamed)
            pl.BlockSpec((flat, yh1p), lambda i: (0, 0)),    # weights: resident
            pl.BlockSpec((yh1p, yh2p), lambda i: (0, 0)),
            pl.BlockSpec((yh2p, dim_y), lambda i: (0, 0)),
            pl.BlockSpec((3, bw), lambda i: (0, 0)),         # bias slab (1 DMA)
        ],
        out_specs=pl.BlockSpec((tm, dim_y), lambda i: (i, 0)),
        compiler_params=pltpu.CompilerParams(
            dimension_semantics=("parallel",)),
        cost_estimate=pl.CostEstimate(flops=flops, transcendentals=0,
                                      bytes_accessed=bytes_accessed),
    )(x_flat, w1, w2, w3, bias)

    return out[:B] if bp != B else out


# ------------------------- multi-rate lifting (reference glue) ----------------
def lift_multirate(x, x1_feats, x2_feats, x3_feats, x1_rate, x2_rate, x3_rate,
                   y_rate):
    """Reproduces the torch.cat([...].reshape(B,-1), ...) lifting exactly."""
    B = x.shape[0]
    n1, n2, n3 = len(x1_feats), len(x2_feats), len(x3_feats)
    idx1 = jnp.arange(x1_rate - 1, y_rate, x1_rate)
    idx2 = jnp.arange(x2_rate - 1, y_rate, x2_rate)
    idx3 = jnp.arange(x3_rate - 1, y_rate, x3_rate)
    p1 = x[:, idx1, :n1].reshape(B, -1)
    p2 = x[:, idx2, n1:n1 + n2].reshape(B, -1)
    p3 = x[:, idx3, x.shape[2] - n3:].reshape(B, -1)
    return jnp.concatenate([p1, p2, p3], axis=1)


# ------------------------------ parameter init -------------------------------
def init_params(key, dim_x, dim_h1, dim_h2, dim_y):
    """Deterministic synthetic init (uniform, scaled by 1/sqrt(fan_in))."""
    ks = jax.random.split(key, 6)

    def u(k, shape, fan_in):
        bound = 1.0 / jnp.sqrt(float(fan_in))
        return jax.random.uniform(k, shape, jnp.float32, -bound, bound)

    return {
        "w1": u(ks[0], (dim_y, dim_x, dim_h1), dim_x),
        "b1": u(ks[1], (dim_y, 1, dim_h1), dim_x),
        "w2": u(ks[2], (dim_y, dim_h1, dim_h2), dim_h1),
        "b2": u(ks[3], (dim_y, 1, dim_h2), dim_h1),
        "w3": u(ks[4], (dim_y, dim_h2, 1), dim_h2),
        "b3": u(ks[5], (dim_y, 1, 1), dim_h2),
    }


# --------------------------- pure-JAX reference ------------------------------
def lmlp_reference(x_lift, params):
    hp = jax.lax.Precision.HIGHEST
    h1 = jnp.maximum(
        jnp.einsum("bd,ydh->ybh", x_lift, params["w1"], precision=hp)
        + params["b1"], 0.0)
    h2 = jnp.maximum(
        jnp.einsum("ybh,yhk->ybk", h1, params["w2"], precision=hp)
        + params["b2"], 0.0)
    y = jnp.einsum("ybk,yko->ybo", h2, params["w3"], precision=hp) + params["b3"]
    return jnp.transpose(y[:, :, 0], (1, 0))  # (B, dim_y)


# ----------------------------------- main ------------------------------------
if __name__ == "__main__":
    # Synthetic config (stands in for the argparse args of multi_rate.py).
    x1_feats = [0, 1]   # 2 features sampled at x1_rate
    x2_feats = [2]      # 1 feature  sampled at x2_rate
    x3_feats = [3]      # 1 feature  sampled at x3_rate
    x1_rate, x2_rate, x3_rate, y_rate = 1, 2, 4, 8

    n1, n2, n3 = len(x1_feats), len(x2_feats), len(x3_feats)
    n_feat = n1 + n2 + n3                                           # 4
    dim_x = (n1 * (y_rate // x1_rate)
             + n2 * (y_rate // x2_rate)
             + n3 * (y_rate // x3_rate))                            # 22
    multiplier = 2
    dim_h1 = dim_x * multiplier                                     # 44
    dim_h2 = 32
    dim_y = 3

    # Batched rows per perf review: enough to occupy the MXU, still tiny data.
    B = 256

    key = jax.random.PRNGKey(0)
    k_x, k_p = jax.random.split(key)
    x = jax.random.normal(k_x, (B, y_rate, n_feat), jnp.float32)
    params = init_params(k_p, dim_x, dim_h1, dim_h2, dim_y)

    # Pack ONCE at init (hoisted out of the per-call path).
    lift_idx = lift_flat_indices(n1, n2, n3, x1_rate, x2_rate, x3_rate,
                                 y_rate, n_feat)
    assert len(lift_idx) == dim_x
    packed = pack_lmlp_params(params, lift_idx, y_rate * n_feat)
    packed = jax.tree_util.tree_map(jax.block_until_ready, packed)

    run = jax.jit(functools.partial(lmlp_pallas, row_tile=128))
    y_out = run(x, packed)
    jax.block_until_ready(y_out)

    # End-to-end reference (explicit lifting + per-head einsum MLPs).
    x_lift = lift_multirate(x, x1_feats, x2_feats, x3_feats,
                            x1_rate, x2_rate, x3_rate, y_rate)
    y_ref = lmlp_reference(x_lift, params)

    assert y_out.shape == (B, dim_y)
    assert jnp.allclose(y_out, y_ref, atol=1e-4, rtol=1e-4)

    print("KERNEL_OK")
</pallas_src>

<mosaic_0001>
module attributes {stable_mosaic.version = 11 : i64} {
  func.func @_lmlp_fused_kernel(%arg0: i32, %arg1: memref<128x32xf32, #tpu.memory_space<vmem>>, %arg2: memref<32x256xf32, #tpu.memory_space<vmem>>, %arg3: memref<256x128xf32, #tpu.memory_space<vmem>>, %arg4: memref<128x3xf32, #tpu.memory_space<vmem>>, %arg5: memref<3x256xf32, #tpu.memory_space<vmem>>, %arg6: memref<128x3xf32, #tpu.memory_space<vmem>>) attributes {dimension_semantics = [#tpu.dimension_semantics<parallel>], iteration_bounds = array<i64: 2>, scalar_prefetch = 0 : i64, scratch_operands = 0 : i64, tpu.core_type = #tpu.core_type<tc>, window_params = [{transform_indices = @transform_0, window_bounds = array<i64: 128, 32>}, {pipeline_mode = #tpu.pipeline_mode<synchronous>, transform_indices = @transform_1, window_bounds = array<i64: 32, 256>}, {pipeline_mode = #tpu.pipeline_mode<synchronous>, transform_indices = @transform_2, window_bounds = array<i64: 256, 128>}, {pipeline_mode = #tpu.pipeline_mode<synchronous>, transform_indices = @transform_3, window_bounds = array<i64: 128, 3>}, {pipeline_mode = #tpu.pipeline_mode<synchronous>, transform_indices = @transform_4, window_bounds = array<i64: 3, 256>}, {transform_indices = @transform_5, window_bounds = array<i64: 128, 3>}]} {
    %c0 = arith.constant 0 : index
    %c0_0 = arith.constant 0 : index
    %0 = vector.load %arg1[%c0, %c0_0] : memref<128x32xf32, #tpu.memory_space<vmem>>, vector<128x32xf32>
    %c0_1 = arith.constant 0 : index
    %c0_2 = arith.constant 0 : index
    %1 = vector.load %arg2[%c0_1, %c0_2] : memref<32x256xf32, #tpu.memory_space<vmem>>, vector<32x256xf32>
    %cst = arith.constant dense<0.000000e+00> : vector<128x256xf32>
    %2 = tpu.matmul %0, %1, %cst {dimension_numbers = #tpu.dot_dimension_numbers<[1], [0], [0], [1], [0, 0, 1, 1], [], []>} : vector<128x32xf32>, vector<32x256xf32>, vector<128x256xf32> -> vector<128x256xf32>
    %c0_3 = arith.constant 0 : index
    %c0_4 = arith.constant 0 : index
    %3 = vector.load %arg5[%c0_3, %c0_4] : memref<3x256xf32, #tpu.memory_space<vmem>>, vector<1x256xf32>
    %4 = vector.broadcast %3 : vector<1x256xf32> to vector<128x256xf32>
    %5 = arith.addf %2, %4 : vector<128x256xf32>
    %cst_5 = arith.constant 0.000000e+00 : f32
    %6 = vector.broadcast %cst_5 : f32 to vector<128x256xf32>
    %7 = arith.maximumf %5, %6 : vector<128x256xf32>
    %c0_6 = arith.constant 0 : index
    %c0_7 = arith.constant 0 : index
    %8 = vector.load %arg3[%c0_6, %c0_7] : memref<256x128xf32, #tpu.memory_space<vmem>>, vector<256x128xf32>
    %cst_8 = arith.constant dense<0.000000e+00> : vector<128x128xf32>
    %9 = tpu.matmul %7, %8, %cst_8 {dimension_numbers = #tpu.dot_dimension_numbers<[1], [0], [0], [1], [0, 0, 1, 1], [], []>} : vector<128x256xf32>, vector<256x128xf32>, vector<128x128xf32> -> vector<128x128xf32>
    %c1 = arith.constant 1 : index
    %c0_9 = arith.constant 0 : index
    %10 = vector.load %arg5[%c1, %c0_9] : memref<3x256xf32, #tpu.memory_space<vmem>>, vector<1x128xf32>
    %11 = vector.broadcast %10 : vector<1x128xf32> to vector<128x128xf32>
    %12 = arith.addf %9, %11 : vector<128x128xf32>
    %cst_10 = arith.constant 0.000000e+00 : f32
    %13 = vector.broadcast %cst_10 : f32 to vector<128x128xf32>
    %14 = arith.maximumf %12, %13 : vector<128x128xf32>
    %c0_11 = arith.constant 0 : index
    %c0_12 = arith.constant 0 : index
    %15 = vector.load %arg4[%c0_11, %c0_12] : memref<128x3xf32, #tpu.memory_space<vmem>>, vector<128x3xf32>
    %cst_13 = arith.constant dense<0.000000e+00> : vector<128x3xf32>
    %16 = tpu.matmul %14, %15, %cst_13 {dimension_numbers = #tpu.dot_dimension_numbers<[1], [0], [0], [1], [0, 0, 1, 1], [], []>} : vector<128x128xf32>, vector<128x3xf32>, vector<128x3xf32> -> vector<128x3xf32>
    %c2 = arith.constant 2 : index
    %c0_14 = arith.constant 0 : index
    %17 = vector.load %arg5[%c2, %c0_14] : memref<3x256xf32, #tpu.memory_space<vmem>>, vector<1x3xf32>
    %18 = vector.broadcast %17 : vector<1x3xf32> to vector<128x3xf32>
    %19 = arith.addf %16, %18 : vector<128x3xf32>
    %c0_15 = arith.constant 0 : index
    %c0_16 = arith.constant 0 : index
    %20 = vector.load %arg6[%c0_15, %c0_16] : memref<128x3xf32, #tpu.memory_space<vmem>>, vector<128x3xf32>
    tpu.vector_store %arg6[%c0_15, %c0_16], %19 {strides = array<i32>} : memref<128x3xf32, #tpu.memory_space<vmem>>, vector<128x3xf32>,
    return
  }
  func.func @transform_0(%arg0: i32) -> (i32, i32) {
    %c0_i32 = arith.constant 0 : i32
    %c0_i32_0 = arith.constant 0 : i32
    return %arg0, %c0_i32 : i32, i32
  }
  func.func @transform_1(%arg0: i32) -> (i32, i32) {
    %c0_i32 = arith.constant 0 : i32
    %c0_i32_0 = arith.constant 0 : i32
    %c0_i32_1 = arith.constant 0 : i32
    return %c0_i32, %c0_i32_0 : i32, i32
  }
  func.func @transform_2(%arg0: i32) -> (i32, i32) {
    %c0_i32 = arith.constant 0 : i32
    %c0_i32_0 = arith.constant 0 : i32
    %c0_i32_1 = arith.constant 0 : i32
    return %c0_i32, %c0_i32_0 : i32, i32
  }
  func.func @transform_3(%arg0: i32) -> (i32, i32) {
    %c0_i32 = arith.constant 0 : i32
    %c0_i32_0 = arith.constant 0 : i32
    %c0_i32_1 = arith.constant 0 : i32
    return %c0_i32, %c0_i32_0 : i32, i32
  }
  func.func @transform_4(%arg0: i32) -> (i32, i32) {
    %c0_i32 = arith.constant 0 : i32
    %c0_i32_0 = arith.constant 0 : i32
    %c0_i32_1 = arith.constant 0 : i32
    return %c0_i32, %c0_i32_0 : i32, i32
  }
  func.func @transform_5(%arg0: i32) -> (i32, i32) {
    %c0_i32 = arith.constant 0 : i32
    %c0_i32_0 = arith.constant 0 : i32
    return %arg0, %c0_i32 : i32, i32
  }
}

</mosaic_0001>

<bundles_post_ra>
// kernel: lmlp_pallas.1
= control target key start
LH: loop header
LB: loop body
LE: loop exit
PB: predicated region body
PF: predicated region fallthrough
CT: control target
= control target key end

     0   :  { %s908_s18 = smov 0   ;;  %s1263_s0 = inlined_call_operand.vmem [shape: f32[256,32], index: 0, kind: input, shape index: {}]   ;;  %s1264_s1 = inlined_call_operand.vmem [shape: f32[32,256], index: 1, kind: input, shape index: {}]   ;;  %s1265_s2 = inlined_call_operand.vmem [shape: f32[256,128], index: 2, kind: input, shape index: {}]   ;;  %s1266_s3 = inlined_call_operand.vmem [shape: f32[128,3], index: 3, kind: input, shape index: {}]   ;;  %s1267_s4 = inlined_call_operand.vmem [shape: f32[3,256], index: 4, kind: input, shape index: {}]   ;;  %s1268_s5 = inlined_call_operand.vmem [shape: f32[256,3], index: 5, kind: output, shape index: {}]  }
   0x1 LB: > { %s805_s19 = sadd.s32 4294967295, %s876_s18   ;;  %p809_p0 = scmp.ge.s32.totalorder %s876_s18, 1  ;;  %s876_s18 = sphi %s908_s18, %s15_s18  }
   0x2   : > { %p188_p1 = scmp.lt.s32.totalorder %s876_s18, 3 }
   0x4   : > { %p189_p2 = pnand %p809_p0, %p188_p1 }
   0x5   : > { %s810_s24 = sshll.u32 (!%p189_p2), %s805_s19, 4 }
   0x6   : > { %192 = sbr.rel (%p189_p2) target bundleno = 574 (0x23e), region = 40  ;;  %p217_p3 = scmp.lt.s32.totalorder (!%p189_p2), %s810_s24, 31 }
   0xb   : > { %v250_v0 = vld [vmem:[%s1264_s1 + $0x30] sm:$0xff]  ;;  %v248_v1 = vld [vmem:[%s1264_s1 + $0x20] sm:$0xff]  ;;  %s1270_s24 = smov (!%p217_p3, %s810_s24), 31  ;;  %vm258_vm0 = vcmask 261120   ;;  %v251_v4 = vld [vmem:[%s1264_s1 + $0x38] sm:$0xff]  ;;  %vm732_vm1 = vcmask 23552  }
   0xc   : > { %319 = vmatpush.msra.mxu0 %v250_v0  ;;  %848 = vmatpush.msra.mxu1 %v250_v0  ;;  %v246_v2 = vld [vmem:[%s1264_s1 + $0x10] sm:$0xff]  ;;  %v244_v3 = vld [vmem:[%s1264_s1] sm:$0xff]  ;;  %s811_s29 = sshll.u32 %s1270_s24, 3  ;;  %v249_v7 = vld [vmem:[%s1264_s1 + $0x28] sm:$0xff] }
   0xd   : > { %849 = vmatpush.msra.mxu2 %v250_v0  ;;  %850 = vmatpush.msra.mxu3 %v250_v0  ;;  %s936_s7 = scalar_lea.vmem %s1263_s0, %s811_s29  ;;  %v247_v8 = vld [vmem:[%s1264_s1 + $0x18] sm:$0xff]  ;;  %v245_v9 = vld [vmem:[%s1264_s1 + $0x8] sm:$0xff]  ;;  %v483_v20 = vld [vmem:[%s1265_s2 + $0x70] sm:$0xff]  ;;  %s1226_s12 = scalar_lea.vmem %s1268_s5, %s811_s29 }
   0xe   : > { %320 = vmatpush.msra.mxu0 %v248_v1  ;;  %851 = vmatpush.msra.mxu1 %v248_v1  ;;  %v228_v5 = vld [vmem:[%s936_s7] sm:$0xff]  ;;  %v229_v10 = vld [vmem:[%s936_s7 + $0x8] sm:$0xff]  ;;  %v230_v12 = vld [vmem:[%s936_s7 + $0x10] sm:$0xff] }
   0xf   : > { %852 = vmatpush.msra.mxu2 %v248_v1  ;;  %853 = vmatpush.msra.mxu3 %v248_v1  ;;  %v232_v6 = vld [vmem:[%s936_s7 + $0x20] sm:$0xff]  ;;  %v233_v11 = vld [vmem:[%s936_s7 + $0x28] sm:$0xff]  ;;  %v234_v13 = vld [vmem:[%s936_s7 + $0x30] sm:$0xff] }
  0x10   : > { %321 = vmatpush.msra.mxu0 %v246_v2  ;;  %854 = vmatpush.msra.mxu1 %v246_v2  ;;  %v231_v14 = vld [vmem:[%s936_s7 + $0x18] sm:$0xff]  ;;  %v236_v16 = vld [vmem:[%s936_s7 + $0x40] sm:$0xff]  ;;  %v237_v17 = vld [vmem:[%s936_s7 + $0x48] sm:$0xff] }
  0x11   : > { %855 = vmatpush.msra.mxu2 %v246_v2  ;;  %856 = vmatpush.msra.mxu3 %v246_v2  ;;  %v235_v15 = vld [vmem:[%s936_s7 + $0x38] sm:$0xff]  ;;  %v975_v18 = vld [vmem:[%s936_s7 + $0x50] sm:$0xff]  ;;  %v482_v21 = vld [vmem:[%s1265_s2 + $0x68] sm:$0xff] }
  0x12   : > { %322 = vmatpush.msra.mxu0 %v244_v3  ;;  %857 = vmatpush.msra.mxu1 %v244_v3  ;;  %v484_v19 = vld [vmem:[%s1265_s2 + $0x78] sm:$0xff]  ;;  %v481_v22 = vld [vmem:[%s1265_s2 + $0x60] sm:$0xff]  ;;  %v479_v25 = vld [vmem:[%s1265_s2 + $0x50] sm:$0xff] }
  0x13   : > { %814 = vmatmul.msk.f32.vlgmr.msra.gmra.mxu0 %vm258_vm0, %v228_v5  ;;  %818 = vmatmul.msk.f32.vlgmr.msra.gmra.mxu1 %vm258_vm0, %v232_v6  ;;  %v993_v23 = vld [vmem:[%s936_s7 + $0x58] sm:$0xff]  ;;  %v478_v26 = vld [vmem:[%s1265_s2 + $0x48] sm:$0xff]  ;;  %v477_v27 = vld [vmem:[%s1265_s2 + $0x40] sm:$0xff] }
  0x14   : > { %384 = vmatpush.msrb.mxu1 %v251_v4  ;;  %858 = vmatpush.msra.mxu2 %v244_v3  ;;  %v480_v24 = vld [vmem:[%s1265_s2 + $0x58] sm:$0xff]  ;;  %v1011_v28 = vld [vmem:[%s936_s7 + $0x60] sm:$0xff]  ;;  %v475_v30 = vld [vmem:[%s1265_s2 + $0x30] sm:$0xff] }
  0x15   : > { %859 = vmatpush.msra.mxu3 %v244_v3  ;;  %823 = vmatmul.msk.f32.vlgmr.msra.gmra.mxu2 %vm258_vm0, %v237_v17  ;;  %v476_v29 = vld [vmem:[%s1265_s2 + $0x38] sm:$0xff]  ;;  %v474_v31 = vld [vmem:[%s1265_s2 + $0x28] sm:$0xff]  ;;  %v473_v32 = vld [vmem:[%s1265_s2 + $0x20] sm:$0xff] }
  0x16   : > { %385 = vmatpush.msrb.mxu1 %v249_v7  ;;  %503 = vmatpush.msrb.mxu2 %v484_v19  ;;  %v1029_v33 = vld [vmem:[%s936_s7 + $0x68] sm:$0xff]  ;;  %v472_v34 = vld [vmem:[%s1265_s2 + $0x18] sm:$0xff]  ;;  %v471_v35 = vld [vmem:[%s1265_s2 + $0x10] sm:$0xff] }
  0x17   : > { %v470_v36 = vld [vmem:[%s1265_s2 + $0x8] sm:$0xff]  ;;  %v469_v37 = vld [vmem:[%s1265_s2] sm:$0xff]  ;;  %v500_v38 = vld [vmem:[%s1265_s2 + $0xf8] sm:$0xff] }
  0x18   : > { %386 = vmatpush.msrb.mxu1 %v247_v8  ;;  %504 = vmatpush.msrb.mxu2 %v483_v20  ;;  %v499_v39 = vld [vmem:[%s1265_s2 + $0xf0] sm:$0xff]  ;;  %v498_v40 = vld [vmem:[%s1265_s2 + $0xe8] sm:$0xff]  ;;  %v497_v42 = vld [vmem:[%s1265_s2 + $0xe0] sm:$0xff] }
  0x19   : > { %568 = vmatpush.msrb.mxu3 %v500_v38  ;;  %v242_v41 = vld [vmem:[%s936_s7 + $0x70] sm:$0xff]  ;;  %v496_v43 = vld [vmem:[%s1265_s2 + $0xd8] sm:$0xff]  ;;  %v494_v45 = vld [vmem:[%s1265_s2 + $0xc8] sm:$0xff] }
  0x1a   : > { %387 = vmatpush.msrb.mxu1 %v245_v9  ;;  %505 = vmatpush.msrb.mxu2 %v482_v21  ;;  %v495_v44 = vld [vmem:[%s1265_s2 + $0xd0] sm:$0xff]  ;;  %v252_v46 = vld [vmem:[%s1267_s4] ss:$4 sm:$0x3]  ;;  %v243_v47 = vld [vmem:[%s936_s7 + $0x78] sm:$0xff] }
  0x1b   : > { %815 = vmatmul.msk.f32.gmra.mxu0 %vm258_vm0, %v229_v10  ;;  %819 = vmatmul.msk.f32.gmra.mxu1 %vm258_vm0, %v233_v11  ;;  %v493_v48 = vld [vmem:[%s1265_s2 + $0xc0] sm:$0xff]  ;;  %v1081_v49 = vperm.slane %v252_v46, 0  ;;  %v492_v50 = vld [vmem:[%s1265_s2 + $0xb8] sm:$0xff]  ;;  %v491_v51 = vld [vmem:[%s1265_s2 + $0xb0] sm:$0xff] }
  0x1c   : > { %506 = vmatpush.msrb.mxu2 %v481_v22  ;;  %569 = vmatpush.msrb.mxu3 %v499_v39  ;;  %v490_v55 = vld [vmem:[%s1265_s2 + $0xa8] sm:$0xff]  ;;  %v489_v57 = vld [vmem:[%s1265_s2 + $0xa0] sm:$0xff]  ;;  %v488_v58 = vld [vmem:[%s1265_s2 + $0x98] sm:$0xff] }
  0x1d   : > { %824 = vmatmul.msk.f32.gmra.mxu2 %vm258_vm0, %v975_v18  ;;  %828 = vmatmul.msk.f32.vlgmr.msra.gmra.mxu3 %vm258_vm0, %v242_v41  ;;  %v487_v59 = vld [vmem:[%s1265_s2 + $0x90] sm:$0xff]  ;;  %v486_v63 = vld [vmem:[%s1265_s2 + $0x88] sm:$0xff]  ;;  %v485_v1 = vld [vmem:[%s1265_s2 + $0x80] sm:$0xff] }
  0x1e   : > { %507 = vmatpush.msrb.mxu2 %v480_v24  ;;  %570 = vmatpush.msrb.mxu3 %v498_v40 }
  0x20   : > { %508 = vmatpush.msrb.mxu2 %v479_v25  ;;  %571 = vmatpush.msrb.mxu3 %v497_v42 }
  0x22   : > { %509 = vmatpush.msrb.mxu2 %v478_v26  ;;  %572 = vmatpush.msrb.mxu3 %v496_v43 }
  0x23   : > { %816 = vmatmul.msk.f32.gmra.mxu0 %vm258_vm0, %v230_v12  ;;  %820 = vmatmul.msk.f32.gmra.mxu1 %vm258_vm0, %v234_v13 }
  0x24   : > { %510 = vmatpush.msrb.mxu2 %v477_v27  ;;  %573 = vmatpush.msrb.mxu3 %v495_v44 }
  0x25   : > { %825 = vmatmul.msk.f32.gmra.mxu2 %vm258_vm0, %v993_v23  ;;  %829 = vmatmul.msk.f32.gmra.mxu3 %vm258_vm0, %v243_v47 }
  0x26   : > { %511 = vmatpush.msrb.mxu2 %v476_v29  ;;  %574 = vmatpush.msrb.mxu3 %v494_v45 }
  0x28   : > { %512 = vmatpush.msrb.mxu2 %v475_v30  ;;  %575 = vmatpush.msrb.mxu3 %v493_v48 }
  0x2a   : > { %513 = vmatpush.msrb.mxu2 %v474_v31  ;;  %576 = vmatpush.msrb.mxu3 %v492_v50 }
  0x2b   : > { %817 = vmatmul.msk.f32.gmra.mxu0 %vm258_vm0, %v231_v14  ;;  %821 = vmatmul.msk.f32.gmra.mxu1 %vm258_vm0, %v235_v15 }
  0x2c   : > { %514 = vmatpush.msrb.mxu2 %v473_v32  ;;  %577 = vmatpush.msrb.mxu3 %v491_v51 }
  0x2d   : > { %826 = vmatmul.msk.f32.gmra.mxu2 %vm258_vm0, %v1011_v28 }
  0x2e   : > { %515 = vmatpush.msrb.mxu2 %v472_v34  ;;  %578 = vmatpush.msrb.mxu3 %v490_v55 }
  0x30   : > { %516 = vmatpush.msrb.mxu2 %v471_v35  ;;  %579 = vmatpush.msrb.mxu3 %v489_v57 }
  0x32   : > { %517 = vmatpush.msrb.mxu2 %v470_v36  ;;  %580 = vmatpush.msrb.mxu3 %v488_v58 }
  0x33   : > { %822 = vmatmul.msk.f32.gmra.mxu1 %vm258_vm0, %v236_v16 }
  0x34   : > { %518 = vmatpush.msrb.mxu2 %v469_v37  ;;  %581 = vmatpush.msrb.mxu3 %v487_v59 }
  0x35   : > { %827 = vmatmul.msk.f32.gmra.mxu2 %vm258_vm0, %v1029_v33 }
  0x36   : > { %582 = vmatpush.msrb.mxu3 %v486_v63 }
  0x38   : > { %583 = vmatpush.msrb.mxu3 %v485_v1 }
  0x3b   : > { %830 = vmatmul.msk.f32.vlgmr.msrb.gmra.mxu1 %vm258_vm0, %v228_v5 }
  0x43   : > { %831 = vmatmul.msk.f32.gmra.mxu1 %vm258_vm0, %v229_v10 }
  0x4b   : > { %832 = vmatmul.msk.f32.gmra.mxu1 %vm258_vm0, %v230_v12 }
  0x53   : > { %833 = vmatmul.msk.f32.gmra.mxu1 %vm258_vm0, %v231_v14 }
  0x5b   : > { %834 = vmatmul.msk.f32.gmra.mxu1 %vm258_vm0, %v232_v6 }
  0x63   : > { %835 = vmatmul.msk.f32.gmra.mxu1 %vm258_vm0, %v233_v11 }
  0x6b   : > { %836 = vmatmul.msk.f32.gmra.mxu1 %vm258_vm0, %v234_v13  ;;  %v1120_v13 = vperm.slane %v252_v46, 1 }
  0x73   : > { %837 = vmatmul.msk.f32.gmra.mxu1 %vm258_vm0, %v235_v15 }
  0x7b   : > { %838 = vmatmul.msk.f32.gmra.mxu1 %vm258_vm0, %v236_v16 }
  0x83   : > { %839 = vmatmul.msk.f32.gmra.mxu1 %vm258_vm0, %v237_v17 }
  0x8b   : > { %840 = vmatmul.msk.f32.gmra.mxu1 %vm258_vm0, %v975_v18 }
  0x90   : > { %v324_v52 = vpop.f32.mrf.mxu0  ;;  %v336_v53 = vpop.f32.mrf.mxu1 }
  0x91   : > { %v325_v54 = vadd.f32 %v324_v52, %v1081_v49  ;;  %v337_v10 = vadd.f32 %v336_v53, %v1081_v49 }
  0x93   : > { %v437_v56 = vmax.f32 %v325_v54, 0.0  ;;  %841 = vmatmul.msk.f32.gmra.mxu1 %vm258_vm0, %v993_v23  ;;  %v445_v12 = vmax.f32 %v337_v10, 0.0 }
  0x95   : > { %519 = vmatmul.f32.vlgmr.msrb.gmra.mxu2 %v437_v56 }
  0x98   : > { %v327_v60 = vpop.f32.mrf.mxu0  ;;  %v339_v61 = vpop.f32.mrf.mxu1 }
  0x99   : > { %v328_v62 = vadd.f32 %v327_v60, %v1081_v49  ;;  %v340_v14 = vadd.f32 %v339_v61, %v1081_v49  ;;  %v351_v30 = vpop.f32.mrf.mxu2 }
  0x9a   : > { %v352_v35 = vadd.f32 %v351_v30, %v1081_v49 }
  0x9b   : > { %v439_v0 = vmax.f32 %v328_v62, 0.0  ;;  %842 = vmatmul.msk.f32.gmra.mxu1 %vm258_vm0, %v1011_v28  ;;  %v447_v17 = vmax.f32 %v340_v14, 0.0  ;;  %v661_v14 = vld [vmem:[%s1266_s3 + $0x60] sm:$0xff] }
  0x9c   : > { %v455_v39 = vmax.f32 %v352_v35, 0.0 }
  0x9d   : > { %522 = vmatmul.f32.gmra.mxu2 %v439_v0 }
  0xa0   : > { %v330_v2 = vpop.f32.mrf.mxu0  ;;  %v342_v3 = vpop.f32.mrf.mxu1 }
  0xa1   : > { %v331_v4 = vadd.f32 %v330_v2, %v1081_v49  ;;  %v343_v19 = vadd.f32 %v342_v3, %v1081_v49  ;;  %v354_v36 = vpop.f32.mrf.mxu2 }
  0xa3   : > { %v441_v5 = vmax.f32 %v331_v4, 0.0  ;;  %843 = vmatmul.msk.f32.gmra.mxu1 %vm258_vm0, %v1029_v33  ;;  %v449_v22 = vmax.f32 %v343_v19, 0.0  ;;  %v664_v4 = vld [vmem:[%s1266_s3 + $0x78] sm:$0xff] }
  0xa4   : > { %667 = vmatpush.msrb.mxu0 %v664_v4 }
  0xa5   : > { %525 = vmatmul.f32.gmra.mxu2 %v441_v5  ;;  %v663_v5 = vld [vmem:[%s1266_s3 + $0x70] sm:$0xff] }
  0xa6   : > { %668 = vmatpush.msrb.mxu0 %v663_v5 }
  0xa8   : > { %v333_v6 = vpop.f32.mrf.mxu0  ;;  %v345_v7 = vpop.f32.mrf.mxu1 }
  0xa9   : > { %v334_v8 = vadd.f32 %v333_v6, %v1081_v49  ;;  %v346_v24 = vadd.f32 %v345_v7, %v1081_v49  ;;  %v357_v43 = vpop.f32.mrf.mxu2  ;;  %v366_v6 = vpop.f32.mrf.mxu3 }
  0xaa   : > { %v367_v7 = vadd.f32 %v366_v6, %v1081_v49 }
  0xab   : > { %v443_v9 = vmax.f32 %v334_v8, 0.0  ;;  %844 = vmatmul.msk.f32.gmra.mxu1 %vm258_vm0, %v242_v41  ;;  %v451_v27 = vmax.f32 %v346_v24, 0.0  ;;  %v355_v41 = vadd.f32 %v354_v36, %v1081_v49  ;;  %v657_v24 = vld [vmem:[%s1266_s3 + $0x40] sm:$0xff]  ;;  %v650_v36 = vld [vmem:[%s1266_s3 + $0x8] sm:$0xff] }
  0xac   : > { %v465_v10 = vmax.f32 %v367_v7, 0.0 }
  0xad   : > { %528 = vmatmul.f32.gmra.mxu2 %v443_v9  ;;  %v457_v45 = vmax.f32 %v355_v41, 0.0 }
  0xb0   : > { %v348_v11 = vpop.f32.mrf.mxu1 }
  0xb1   : > { %v349_v29 = vadd.f32 %v348_v11, %v1081_v49  ;;  %v360_v52 = vpop.f32.mrf.mxu2  ;;  %v662_v11 = vld [vmem:[%s1266_s3 + $0x68] sm:$0xff] }
  0xb2   : > { %v361_v54 = vadd.f32 %v360_v52, %v1081_v49  ;;  %669 = vmatpush.msrb.mxu0 %v662_v11 }
  0xb3   : > { %845 = vmatmul.msk.f32.gmra.mxu1 %vm258_vm0, %v243_v47  ;;  %v453_v33 = vmax.f32 %v349_v29, 0.0  ;;  %v358_v47 = vadd.f32 %v357_v43, %v1081_v49  ;;  %v653_v29 = vld [vmem:[%s1266_s3 + $0x20] sm:$0xff] }
  0xb4   : > { %v461_v57 = vmax.f32 %v361_v54, 0.0  ;;  %670 = vmatpush.msrb.mxu0 %v661_v14 }
  0xb5   : > { %531 = vmatmul.f32.gmra.mxu2 %v445_v12  ;;  %v459_v51 = vmax.f32 %v358_v47, 0.0  ;;  %v1200_v47 = vld [vmem:[%s1267_s4 + $0x1] ss:$0 sm:$0xff] }
  0xb8   : > { %v389_v15 = vpop.f32.mrf.mxu1 }
  0xb9   : > { %v390_v16 = vadd.f32 %v389_v15, %v1120_v13  ;;  %v363_v59 = vpop.f32.mrf.mxu2  ;;  %v660_v15 = vld [vmem:[%s1266_s3 + $0x58] sm:$0xff] }
  0xba   : > { %v364_v60 = vadd.f32 %v363_v59, %v1081_v49  ;;  %671 = vmatpush.msrb.mxu0 %v660_v15 }
  0xbb   : > { %v438_v18 = vmax.f32 %v390_v16, 0.0  ;;  %v659_v16 = vld [vmem:[%s1266_s3 + $0x50] sm:$0xff] }
  0xbc   : > { %v463_v63 = vmax.f32 %v364_v60, 0.0  ;;  %672 = vmatpush.msrb.mxu0 %v659_v16 }
  0xbd   : > { %534 = vmatmul.f32.gmra.mxu2 %v447_v17  ;;  %584 = vmatmul.f32.vlgmr.msrb.gmra.mxu3 %v438_v18  ;;  %v369_v17 = vpop.f32.mrf.mxu3 }
  0xbe   : > { %v370_v18 = vadd.f32 %v369_v17, %v1081_v49  ;;  %v656_v49 = vld [vmem:[%s1266_s3 + $0x38] sm:$0xff] }
  0xc0   : > { %v392_v20 = vpop.f32.mrf.mxu1 }
  0xc1   : > { %v393_v21 = vadd.f32 %v392_v20, %v1120_v13 }
  0xc3   : > { %v440_v23 = vmax.f32 %v393_v21, 0.0  ;;  %v467_v21 = vmax.f32 %v370_v18, 0.0 }
  0xc5   : > { %537 = vmatmul.f32.gmra.mxu2 %v449_v22  ;;  %587 = vmatmul.f32.gmra.mxu3 %v440_v23  ;;  %v658_v22 = vld [vmem:[%s1266_s3 + $0x48] sm:$0xff] }
  0xc6   : > { %673 = vmatpush.msrb.mxu0 %v658_v22 }
  0xc8   : > { %v395_v25 = vpop.f32.mrf.mxu1  ;;  %674 = vmatpush.msrb.mxu0 %v657_v24 }
  0xc9   : > { %v396_v26 = vadd.f32 %v395_v25, %v1120_v13  ;;  %v655_v25 = vld [vmem:[%s1266_s3 + $0x30] sm:$0xff] }
  0xca   : > { %675 = vmatpush.msrb.mxu0 %v656_v49 }
  0xcb   : > { %v442_v28 = vmax.f32 %v396_v26, 0.0 }
  0xcc   : > { %676 = vmatpush.msrb.mxu0 %v655_v25 }
  0xcd   : > { %540 = vmatmul.f32.gmra.mxu2 %v451_v27  ;;  %590 = vmatmul.f32.gmra.mxu3 %v442_v28  ;;  %v654_v28 = vld [vmem:[%s1266_s3 + $0x28] sm:$0xff] }
  0xce   : > { %677 = vmatpush.msrb.mxu0 %v654_v28 }
  0xd0   : > { %v398_v31 = vpop.f32.mrf.mxu1  ;;  %678 = vmatpush.msrb.mxu0 %v653_v29 }
  0xd1   : > { %v399_v32 = vadd.f32 %v398_v31, %v1120_v13  ;;  %v652_v31 = vld [vmem:[%s1266_s3 + $0x18] sm:$0xff] }
  0xd2   : > { %679 = vmatpush.msrb.mxu0 %v652_v31 }
  0xd3   : > { %v444_v34 = vmax.f32 %v399_v32, 0.0  ;;  %v651_v32 = vld [vmem:[%s1266_s3 + $0x10] sm:$0xff] }
  0xd4   : > { %680 = vmatpush.msrb.mxu0 %v651_v32 }
  0xd5   : > { %543 = vmatmul.f32.gmra.mxu2 %v453_v33  ;;  %593 = vmatmul.f32.gmra.mxu3 %v444_v34 }
  0xd6   : > { %681 = vmatpush.msrb.mxu0 %v650_v36 }
  0xd8   : > { %v401_v37 = vpop.f32.mrf.mxu1 }
  0xd9   : > { %v402_v38 = vadd.f32 %v401_v37, %v1120_v13 }
  0xdb   : > { %v446_v40 = vmax.f32 %v402_v38, 0.0  ;;  %v649_v38 = vld [vmem:[%s1266_s3] sm:$0xff] }
  0xdc   : > { %682 = vmatpush.msrb.mxu0 %v649_v38 }
  0xdd   : > { %596 = vmatmul.f32.gmra.mxu3 %v446_v40  ;;  %546 = vmatmul.f32.gmra.mxu2 %v455_v39 }
  0xe0   : > { %v404_v42 = vpop.f32.mrf.mxu1 }
  0xe1   : > { %v405_v44 = vadd.f32 %v404_v42, %v1120_v13 }
  0xe3   : > { %v448_v46 = vmax.f32 %v405_v44, 0.0 }
  0xe5   : > { %599 = vmatmul.f32.gmra.mxu3 %v448_v46  ;;  %549 = vmatmul.f32.gmra.mxu2 %v457_v45 }
  0xe8   : > { %v407_v48 = vpop.f32.mrf.mxu1 }
  0xe9   : > { %v408_v50 = vadd.f32 %v407_v48, %v1120_v13 }
  0xeb   : > { %v450_v53 = vmax.f32 %v408_v50, 0.0 }
  0xed   : > { %602 = vmatmul.f32.gmra.mxu3 %v450_v53  ;;  %552 = vmatmul.f32.gmra.mxu2 %v459_v51 }
  0xf0   : > { %v410_v55 = vpop.f32.mrf.mxu1 }
  0xf1   : > { %v411_v56 = vadd.f32 %v410_v55, %v1120_v13 }
  0xf3   : > { %v452_v58 = vmax.f32 %v411_v56, 0.0 }
  0xf5   : > { %605 = vmatmul.f32.gmra.mxu3 %v452_v58  ;;  %555 = vmatmul.f32.gmra.mxu2 %v461_v57 }
  0xf8   : > { %v413_v61 = vpop.f32.mrf.mxu1 }
  0xf9   : > { %v414_v62 = vadd.f32 %v413_v61, %v1120_v13 }
  0xfb   : > { %v454_v0 = vmax.f32 %v414_v62, 0.0 }
  0xfd   : > { %608 = vmatmul.f32.gmra.mxu3 %v454_v0  ;;  %558 = vmatmul.f32.gmra.mxu2 %v463_v63 }
 0x100   : > { %v416_v1 = vpop.f32.mrf.mxu1 }
 0x101   : > { %v417_v2 = vadd.f32 %v416_v1, %v1120_v13 }
 0x103   : > { %v456_v3 = vmax.f32 %v417_v2, 0.0 }
 0x105   : > { %611 = vmatmul.f32.gmra.mxu3 %v456_v3  ;;  %561 = vmatmul.f32.gmra.mxu2 %v465_v10 }
 0x108   : > { %v419_v8 = vpop.f32.mrf.mxu1 }
 0x109   : > { %v420_v9 = vadd.f32 %v419_v8, %v1120_v13 }
 0x10b   : > { %v458_v12 = vmax.f32 %v420_v9, 0.0 }
 0x10d   : > { %614 = vmatmul.f32.gmra.mxu3 %v458_v12  ;;  %564 = vmatmul.f32.gmra.mxu2 %v467_v21 }
 0x110   : > { %v422_v19 = vpop.f32.mrf.mxu1 }
 0x111   : > { %v423_v20 = vadd.f32 %v422_v19, %v1120_v13 }
 0x113   : > { %v460_v23 = vmax.f32 %v423_v20, 0.0 }
 0x115   : > { %617 = vmatmul.f32.gmra.mxu3 %v460_v23 }
 0x118   : > { %v425_v26 = vpop.f32.mrf.mxu1  ;;  %v520_v33 = vpop.f32.mrf.mxu2 }
 0x119   : > { %v426_v27 = vadd.f32 %v425_v26, %v1120_v13  ;;  %v521_v50 = vadd.f32 %v1200_v47, %v520_v33 }
 0x11b   : > { %v462_v30 = vmax.f32 %v426_v27, 0.0 }
 0x11d   : > { %620 = vmatmul.f32.gmra.mxu3 %v462_v30 }
 0x120   : > { %v428_v34 = vpop.f32.mrf.mxu1  ;;  %v523_v39 = vpop.f32.mrf.mxu2 }
 0x121   : > { %v429_v35 = vadd.f32 %v428_v34, %v1120_v13  ;;  %v524_v54 = vadd.f32 %v1200_v47, %v523_v39 }
 0x123   : > { %v464_v37 = vmax.f32 %v429_v35, 0.0 }
 0x125   : > { %623 = vmatmul.f32.gmra.mxu3 %v464_v37 }
 0x128   : > { %v431_v40 = vpop.f32.mrf.mxu1  ;;  %v526_v45 = vpop.f32.mrf.mxu2 }
 0x129   : > { %v432_v41 = vadd.f32 %v431_v40, %v1120_v13  ;;  %v527_v58 = vadd.f32 %v1200_v47, %v526_v45 }
 0x12b   : > { %v466_v42 = vmax.f32 %v432_v41, 0.0 }
 0x12d   : > { %626 = vmatmul.f32.gmra.mxu3 %v466_v42 }
 0x130   : > { %v434_v43 = vpop.f32.mrf.mxu1  ;;  %v529_v48 = vpop.f32.mrf.mxu2 }
 0x131   : > { %v435_v44 = vadd.f32 %v434_v43, %v1120_v13  ;;  %v530_v63 = vadd.f32 %v1200_v47, %v529_v48 }
 0x133   : > { %v468_v46 = vmax.f32 %v435_v44, 0.0 }
 0x135   : > { %629 = vmatmul.f32.gmra.mxu3 %v468_v46 }
 0x138   : > { %v532_v55 = vpop.f32.mrf.mxu2 }
 0x139   : > { %v533_v4 = vadd.f32 %v1200_v47, %v532_v55 }
 0x140   : > { %v585_v51 = vpop.f32.mrf.mxu3  ;;  %v535_v59 = vpop.f32.mrf.mxu2 }
 0x141   : > { %v586_v52 = vadd.f32 %v585_v51, %v521_v50  ;;  %v536_v9 = vadd.f32 %v1200_v47, %v535_v59 }
 0x143   : > { %v633_v53 = vmax.f32 %v586_v52, 0.0 }
 0x145   : > { %683 = vmatmul.f32.vlgmr.msrb.gmra.mxu0 %v633_v53 }
 0x148   : > { %v588_v56 = vpop.f32.mrf.mxu3  ;;  %v538_v2 = vpop.f32.mrf.mxu2 }
 0x149   : > { %v589_v13 = vadd.f32 %v588_v56, %v524_v54  ;;  %v539_v15 = vadd.f32 %v1200_v47, %v538_v2 }
 0x14b   : > { %v634_v57 = vmax.f32 %v589_v13, 0.0 }
 0x14d   : > { %686 = vmatmul.f32.gmra.mxu0 %v634_v57 }
 0x150   : > { %v591_v60 = vpop.f32.mrf.mxu3  ;;  %v541_v8 = vpop.f32.mrf.mxu2 }
 0x151   : > { %v592_v61 = vadd.f32 %v591_v60, %v527_v58  ;;  %v542_v20 = vadd.f32 %v1200_v47, %v541_v8 }
 0x153   : > { %v635_v62 = vmax.f32 %v592_v61, 0.0 }
 0x155   : > { %689 = vmatmul.f32.gmra.mxu0 %v635_v62  ;;  %v869_v62 = vld [vmem:[%s1267_s4 + $0x2] ss:$0 sm:$0xff] }
 0x158   : > { %v594_v0 = vpop.f32.mrf.mxu3  ;;  %v544_v14 = vpop.f32.mrf.mxu2 }
 0x159   : > { %v595_v1 = vadd.f32 %v594_v0, %v530_v63  ;;  %v545_v24 = vadd.f32 %v1200_v47, %v544_v14 }
 0x15b   : > { %v636_v3 = vmax.f32 %v595_v1, 0.0 }
 0x15d   : > { %692 = vmatmul.f32.gmra.mxu0 %v636_v3 }
 0x160   : > { %v597_v5 = vpop.f32.mrf.mxu3  ;;  %v547_v19 = vpop.f32.mrf.mxu2 }
 0x161   : > { %v598_v6 = vadd.f32 %v597_v5, %v533_v4  ;;  %v548_v28 = vadd.f32 %v1200_v47, %v547_v19 }
 0x163   : > { %v637_v7 = vmax.f32 %v598_v6, 0.0 }
 0x165   : > { %695 = vmatmul.f32.gmra.mxu0 %v637_v7 }
 0x168   : > { %v600_v10 = vpop.f32.mrf.mxu3  ;;  %v550_v25 = vpop.f32.mrf.mxu2 }
 0x169   : > { %v601_v11 = vadd.f32 %v600_v10, %v536_v9  ;;  %v551_v33 = vadd.f32 %v1200_v47, %v550_v25 }
 0x16b   : > { %v638_v12 = vmax.f32 %v601_v11, 0.0 }
 0x16d   : > { %698 = vmatmul.f32.gmra.mxu0 %v638_v12 }
 0x170   : > { %v603_v16 = vpop.f32.mrf.mxu3  ;;  %v553_v31 = vpop.f32.mrf.mxu2 }
 0x171   : > { %v604_v17 = vadd.f32 %v603_v16, %v539_v15  ;;  %v554_v38 = vadd.f32 %v1200_v47, %v553_v31 }
 0x173   : > { %v639_v18 = vmax.f32 %v604_v17, 0.0 }
 0x175   : > { %701 = vmatmul.f32.gmra.mxu0 %v639_v18 }
 0x178   : > { %v606_v21 = vpop.f32.mrf.mxu3  ;;  %v556_v37 = vpop.f32.mrf.mxu2 }
 0x179   : > { %v607_v22 = vadd.f32 %v606_v21, %v542_v20  ;;  %v557_v42 = vadd.f32 %v1200_v47, %v556_v37 }
 0x17b   : > { %v640_v23 = vmax.f32 %v607_v22, 0.0 }
 0x17d   : > { %704 = vmatmul.f32.gmra.mxu0 %v640_v23 }
 0x180   : > { %v609_v49 = vpop.f32.mrf.mxu3  ;;  %v559_v43 = vpop.f32.mrf.mxu2 }
 0x181   : > { %v610_v26 = vadd.f32 %v609_v49, %v545_v24  ;;  %v560_v48 = vadd.f32 %v1200_v47, %v559_v43 }
 0x183   : > { %v641_v27 = vmax.f32 %v610_v26, 0.0 }
 0x185   : > { %707 = vmatmul.f32.gmra.mxu0 %v641_v27 }
 0x188   : > { %v612_v29 = vpop.f32.mrf.mxu3  ;;  %v562_v51 = vpop.f32.mrf.mxu2 }
 0x189   : > { %v613_v30 = vadd.f32 %v612_v29, %v548_v28  ;;  %v563_v54 = vadd.f32 %v1200_v47, %v562_v51 }
 0x18b   : > { %v642_v32 = vmax.f32 %v613_v30, 0.0 }
 0x18d   : > { %710 = vmatmul.f32.gmra.mxu0 %v642_v32 }
 0x190   : > { %v615_v34 = vpop.f32.mrf.mxu3  ;;  %v565_v13 = vpop.f32.mrf.mxu2 }
 0x191   : > { %v616_v35 = vadd.f32 %v615_v34, %v551_v33  ;;  %v566_v58 = vadd.f32 %v1200_v47, %v565_v13 }
 0x193   : > { %v643_v36 = vmax.f32 %v616_v35, 0.0 }
 0x195   : > { %713 = vmatmul.f32.gmra.mxu0 %v643_v36 }
 0x198   : > { %v618_v39 = vpop.f32.mrf.mxu3 }
 0x199   : > { %v619_v40 = vadd.f32 %v618_v39, %v554_v38 }
 0x19b   : > { %v644_v41 = vmax.f32 %v619_v40, 0.0 }
 0x19d   : > { %716 = vmatmul.f32.gmra.mxu0 %v644_v41 }
 0x1a0   : > { %v621_v44 = vpop.f32.mrf.mxu3 }
 0x1a1   : > { %v622_v45 = vadd.f32 %v621_v44, %v557_v42 }
 0x1a3   : > { %v645_v46 = vmax.f32 %v622_v45, 0.0 }
 0x1a5   : > { %719 = vmatmul.f32.gmra.mxu0 %v645_v46 }
 0x1a8   : > { %v624_v50 = vpop.f32.mrf.mxu3 }
 0x1a9   : > { %v625_v52 = vadd.f32 %v624_v50, %v560_v48 }
 0x1ab   : > { %v646_v53 = vmax.f32 %v625_v52, 0.0 }
 0x1ad   : > { %722 = vmatmul.f32.gmra.mxu0 %v646_v53 }
 0x1b0   : > { %v627_v55 = vpop.f32.mrf.mxu3 }
 0x1b1   : > { %v628_v56 = vadd.f32 %v627_v55, %v563_v54 }
 0x1b3   : > { %v647_v57 = vmax.f32 %v628_v56, 0.0 }
 0x1b5   : > { %725 = vmatmul.f32.gmra.mxu0 %v647_v57 }
 0x1b8   : > { %v630_v59 = vpop.f32.mrf.mxu3 }
 0x1b9   : > { %v631_v60 = vadd.f32 %v630_v59, %v566_v58 }
 0x1bb   : > { %v648_v61 = vmax.f32 %v631_v60, 0.0 }
 0x1bd   : > { %728 = vmatmul.f32.gmra.mxu0 %v648_v61 }
 0x1c2   : > { %v684_v47 = vpop.f32.mrf.mxu0 }
 0x1c3   : > { %v685_v63 = vadd.f32 %v869_v62, %v684_v47 }
 0x1c5   : > { %733 = vst.msk [vmem:[%s1226_s12] sm:$0xff] %vm732_vm1, %v685_v63 }
 0x1ca   : > { %v687_v0 = vpop.f32.mrf.mxu0 }
 0x1cb   : > { %v688_v1 = vadd.f32 %v869_v62, %v687_v0 }
 0x1cd   : > { %734 = vst.msk [vmem:[%s1226_s12 + $0x8] sm:$0xff] %vm732_vm1, %v688_v1 }
 0x1d2   : > { %v690_v2 = vpop.f32.mrf.mxu0 }
 0x1d3   : > { %v691_v3 = vadd.f32 %v869_v62, %v690_v2 }
 0x1d5   : > { %735 = vst.msk [vmem:[%s1226_s12 + $0x10] sm:$0xff] %vm732_vm1, %v691_v3 }
 0x1da   : > { %v693_v4 = vpop.f32.mrf.mxu0 }
 0x1db   : > { %v694_v5 = vadd.f32 %v869_v62, %v693_v4 }
 0x1dd   : > { %736 = vst.msk [vmem:[%s1226_s12 + $0x18] sm:$0xff] %vm732_vm1, %v694_v5 }
 0x1e2   : > { %v696_v6 = vpop.f32.mrf.mxu0 }
 0x1e3   : > { %v697_v7 = vadd.f32 %v869_v62, %v696_v6 }
 0x1e5   : > { %737 = vst.msk [vmem:[%s1226_s12 + $0x20] sm:$0xff] %vm732_vm1, %v697_v7 }
 0x1ea   : > { %v699_v8 = vpop.f32.mrf.mxu0 }
 0x1eb   : > { %v700_v9 = vadd.f32 %v869_v62, %v699_v8 }
 0x1ed   : > { %738 = vst.msk [vmem:[%s1226_s12 + $0x28] sm:$0xff] %vm732_vm1, %v700_v9 }
 0x1f2   : > { %v702_v10 = vpop.f32.mrf.mxu0 }
 0x1f3   : > { %v703_v11 = vadd.f32 %v869_v62, %v702_v10 }
 0x1f5   : > { %739 = vst.msk [vmem:[%s1226_s12 + $0x30] sm:$0xff] %vm732_vm1, %v703_v11 }
 0x1fa   : > { %v705_v12 = vpop.f32.mrf.mxu0 }
 0x1fb   : > { %v706_v14 = vadd.f32 %v869_v62, %v705_v12 }
 0x1fd   : > { %740 = vst.msk [vmem:[%s1226_s12 + $0x38] sm:$0xff] %vm732_vm1, %v706_v14 }
 0x202   : > { %v708_v15 = vpop.f32.mrf.mxu0 }
 0x203   : > { %v709_v16 = vadd.f32 %v869_v62, %v708_v15 }
 0x205   : > { %741 = vst.msk [vmem:[%s1226_s12 + $0x40] sm:$0xff] %vm732_vm1, %v709_v16 }
 0x20a   : > { %v711_v17 = vpop.f32.mrf.mxu0 }
 0x20b   : > { %v712_v18 = vadd.f32 %v869_v62, %v711_v17 }
 0x20d   : > { %742 = vst.msk [vmem:[%s1226_s12 + $0x48] sm:$0xff] %vm732_vm1, %v712_v18 }
 0x212   : > { %v714_v19 = vpop.f32.mrf.mxu0 }
 0x213   : > { %v715_v20 = vadd.f32 %v869_v62, %v714_v19 }
 0x215   : > { %743 = vst.msk [vmem:[%s1226_s12 + $0x50] sm:$0xff] %vm732_vm1, %v715_v20 }
 0x21a   : > { %v717_v21 = vpop.f32.mrf.mxu0 }
 0x21b   : > { %v718_v22 = vadd.f32 %v869_v62, %v717_v21 }
 0x21d   : > { %744 = vst.msk [vmem:[%s1226_s12 + $0x58] sm:$0xff] %vm732_vm1, %v718_v22 }
 0x222   : > { %v720_v23 = vpop.f32.mrf.mxu0 }
 0x223   : > { %v721_v24 = vadd.f32 %v869_v62, %v720_v23 }
 0x225   : > { %745 = vst.msk [vmem:[%s1226_s12 + $0x60] sm:$0xff] %vm732_vm1, %v721_v24 }
 0x22a   : > { %v723_v49 = vpop.f32.mrf.mxu0 }
 0x22b   : > { %v724_v25 = vadd.f32 %v869_v62, %v723_v49 }
 0x22d   : > { %746 = vst.msk [vmem:[%s1226_s12 + $0x68] sm:$0xff] %vm732_vm1, %v724_v25 }
 0x232   : > { %v726_v26 = vpop.f32.mrf.mxu0 }
 0x233   : > { %v727_v27 = vadd.f32 %v869_v62, %v726_v26 }
 0x235   : > { %747 = vst.msk [vmem:[%s1226_s12 + $0x70] sm:$0xff] %vm732_vm1, %v727_v27 }
 0x23a   : > { %v729_v28 = vpop.f32.mrf.mxu0 }
 0x23b   : > { %v730_v29 = vadd.f32 %v869_v62, %v729_v28 }
 0x23d   : > { %748 = vst.msk [vmem:[%s1226_s12 + $0x78] sm:$0xff] %vm732_vm1, %v730_v29 }
 0x23e PF: > { %s15_s18 = sadd.s32 1, %s876_s18  }
 0x23f   : > { %p12_p4 = scmp.ge.s32.totalorder %s15_s18, 4  }
 0x241   :  { %14 = sbr.rel (!%p12_p4) target bundleno = 1 (0x1), region = 70 }

</bundles_post_ra>
